<compile_context>
chip_gen: v7x
topology: tpu7x:2x2x1
jax: 0.10.0
libtpu: 0.0.40
codegen_flags: <defaults>
</compile_context>

<pallas_src>
import functools

import jax
import jax.numpy as jnp
from jax.experimental import pallas as pl
from jax.experimental.pallas import tpu as pltpu

_LANE = 128
_BASE_SUBLANES = 8
_CHUNK_BLOCKS = 8          # compute chunk = (8, sub, 128) slabs inside the tile loop


@functools.lru_cache(maxsize=None)
def _gen_params():
    """Generation-aware (per-input tile bytes, split count, vmem_limit_bytes)."""
    kind = ""
    try:
        kind = (jax.devices()[0].device_kind or "").lower()
    except Exception:
        pass
    if "v7" in kind:       # 2 TensorCores, ~3.2 TB/s HBM, 64 MiB physical VMEM
        return (4 << 20, 2, 28 << 20)
    if "v6" in kind:       # 1 TC, ~1.4 TB/s HBM, 128 MiB physical VMEM
        return (4 << 20, 1, 32 << 20)
    # v5e / unknown: conservative (16 MiB default scoped VMEM, ~0.8 TB/s HBM)
    return (2 << 20, 1, 16 << 20)


def _ceil_div(a, b):
    return -(-a // b)


def _sublane_multiple(*dtypes):
    """Native sublane tile rows for the narrowest participating dtype."""
    m = _BASE_SUBLANES
    for dt in dtypes:
        itemsize = max(1, jnp.dtype(dt).itemsize)
        m = max(m, _BASE_SUBLANES * max(1, 4 // itemsize))
    return m


def _make_sse_kernel(steps, tile_blocks, chunk_blocks, sub, blocks_valid, needs_mask):
    """Sum-of-squared-error kernel accumulating into a resident (sub, 128) block."""
    num_chunks = tile_blocks // chunk_blocks

    def kernel(pred_ref, lbl_ref, out_ref):
        step = pl.program_id(1)

        @pl.when(step == 0)
        def _init():
            out_ref[...] = jnp.zeros_like(out_ref)

        # First (sub,128)-slab index covered by this tile (unclamped — the
        # index_map clamp below only affects which data is DMA'd; masking here
        # zeroes any duplicated / out-of-range slabs).
        tile_start = (pl.program_id(0) * steps + step) * tile_blocks

        def chunk_body(ci, acc):
            off = pl.multiple_of(ci * chunk_blocks, chunk_blocks)
            p = pred_ref[pl.ds(off, chunk_blocks)].astype(jnp.float32)
            l = lbl_ref[pl.ds(off, chunk_blocks)].astype(jnp.float32)
            d = p - l
            if needs_mask:
                blk = (tile_start + off
                       + jax.lax.broadcasted_iota(jnp.int32, d.shape, 0))
                d = jnp.where(blk < blocks_valid, d, jnp.float32(0.0))
            # VPU-only fold of the chunk down to one (sub, 128) f32 slab.
            return acc + jnp.sum(d * d, axis=0)

        acc = jax.lax.fori_loop(0, num_chunks, chunk_body,
                                jnp.zeros((sub, _LANE), jnp.float32))
        out_ref[...] += acc

    return kernel


def _mse_loss_impl(pred, lbl):
    assert pred.shape == lbl.shape, (pred.shape, lbl.shape)
    n = int(pred.size)
    if n == 0:
        return jnp.float32(0.0)

    tile_bytes, gen_splits, vmem_limit = _gen_params()
    sub = _sublane_multiple(pred.dtype, lbl.dtype)
    max_itemsize = max(jnp.dtype(pred.dtype).itemsize, jnp.dtype(lbl.dtype).itemsize)
    unit = sub * _LANE

    blocks = n // unit
    if blocks == 0:
        # Tiny input: not worth a kernel launch.
        d = pred.reshape(-1).astype(jnp.float32) - lbl.reshape(-1).astype(jnp.float32)
        return jnp.sum(d * d) / n

    n_main = blocks * unit
    if n_main == n:
        # Aligned case: no pad, no slice — just a reshape to (blocks, sub, 128).
        p3 = pred.reshape(blocks, sub, _LANE)
        l3 = lbl.reshape(blocks, sub, _LANE)
        tail_sse = jnp.float32(0.0)
    else:
        # Ragged tail (< sub*128 elements) handled with a one-line jnp op;
        # the kernel only sees the aligned prefix.
        pf = pred.reshape(-1)
        lf = lbl.reshape(-1)
        p3 = jax.lax.slice(pf, (0,), (n_main,)).reshape(blocks, sub, _LANE)
        l3 = jax.lax.slice(lf, (0,), (n_main,)).reshape(blocks, sub, _LANE)
        td = (jax.lax.slice(pf, (n_main,), (n,)).astype(jnp.float32)
              - jax.lax.slice(lf, (n_main,), (n,)).astype(jnp.float32))
        tail_sse = jnp.sum(td * td)

    # Outer "parallel" split axis: 2 only on v7x (two TensorCores), else 1.
    splits = max(1, min(gen_splits, blocks))
    blocks_per_split = _ceil_div(blocks, splits)

    # Largest tile (in (sub,128) slabs) within the generation's tile budget,
    # rounded to a multiple of the in-kernel chunk size.
    max_tile_blocks = max(_CHUNK_BLOCKS, tile_bytes // (unit * max_itemsize))
    tile_blocks = min(max_tile_blocks, blocks_per_split)
    if tile_blocks >= _CHUNK_BLOCKS:
        tile_blocks -= tile_blocks % _CHUNK_BLOCKS
        chunk_blocks = _CHUNK_BLOCKS
    else:
        chunk_blocks = tile_blocks
    steps = _ceil_div(blocks_per_split, tile_blocks)

    total_tiles = _ceil_div(blocks, tile_blocks)          # tiles along axis 0
    last_tile = total_tiles - 1
    needs_mask = (splits * steps * tile_blocks) != blocks

    # Clamp overrunning tile indices to the last real tile; any duplicated /
    # partially-OOB data is zeroed by the in-kernel mask before accumulation.
    def in_map(c, k):
        return (jnp.minimum(c * steps + k, last_tile), 0, 0)

    kernel = _make_sse_kernel(steps, tile_blocks, chunk_blocks, sub, blocks, needs_mask)

    partial = pl.pallas_call(
        kernel,
        out_shape=jax.ShapeDtypeStruct((splits * sub, _LANE), jnp.float32),
        grid_spec=pltpu.PrefetchScalarGridSpec(
            num_scalar_prefetch=0,
            grid=(splits, steps),
            in_specs=[
                pl.BlockSpec((tile_blocks, sub, _LANE), in_map),
                pl.BlockSpec((tile_blocks, sub, _LANE), in_map),
            ],
            out_specs=pl.BlockSpec((sub, _LANE), lambda c, k: (c, 0)),
        ),
        compiler_params=pltpu.CompilerParams(
            dimension_semantics=("parallel", "arbitrary"),
            vmem_limit_bytes=vmem_limit,
        ),
    )(p3, l3)

    # Tiny epilogue (fused into this jit): cross-lane sum of the resident
    # accumulator blocks + ragged tail + 1/N scaling.
    return (jnp.sum(partial) + tail_sse) / n


# jit the whole wrapper: reshape/slice + pallas_call + epilogue are one launch
# sequence, which matters for metric-sized (latency-bound) inputs.
mse_loss_pallas = jax.jit(_mse_loss_impl)


class LossClass:
    """JAX/Pallas port of metrics.LossClass (epoch-mean loss tracker)."""

    def __init__(self):
        self.loss = 0
        self.cnt = 0

    def forward(self, pred, lbl):
        # TODO(synk): abstract in the original; representative MSE loss used here.
        return mse_loss_pallas(pred, lbl)

    def __call__(self, pred, lbl):
        return self.forward(pred, lbl)

    def update(self, loss, size):
        # mirrors: self.loss += loss.item() * size ; self.cnt += 1
        self.loss += float(loss) * size
        self.cnt += 1

    def reset(self):
        self.loss = 0
        self.cnt = 0

    def get_loss(self):
        return self.loss / self.cnt


if __name__ == "__main__":
    key = jax.random.PRNGKey(0)
    kp, kl = jax.random.split(key)

    # NCHW inputs consistent with a conv-style prediction / label pair.
    B, C, H, W = 2, 4, 16, 16
    pred = jax.random.normal(kp, (B, C, H, W), dtype=jnp.float32)
    lbl = jax.random.normal(kl, (B, C, H, W), dtype=jnp.float32)

    metric = LossClass()
    loss = jax.block_until_ready(metric(pred, lbl))
    ref = jnp.mean((pred - lbl) ** 2)
    assert jnp.allclose(loss, ref, rtol=1e-5, atol=1e-6), (loss, ref)

    # odd-sized input exercises the aligned-prefix + JAX ragged-tail path
    pred2 = jax.random.normal(kp, (3, 5, 7, 11), dtype=jnp.float32)
    lbl2 = jax.random.normal(kl, (3, 5, 7, 11), dtype=jnp.float32)
    loss2 = jax.block_until_ready(metric(pred2, lbl2))
    ref2 = jnp.mean((pred2 - lbl2) ** 2)
    assert jnp.allclose(loss2, ref2, rtol=1e-5, atol=1e-6), (loss2, ref2)

    # non-tile-multiple block count exercises the in-kernel iota mask /
    # boundary-block path (11 slabs, tiles of 8)
    pred3 = jax.random.normal(kp, (11, 8, 128), dtype=jnp.float32)
    lbl3 = jax.random.normal(kl, (11, 8, 128), dtype=jnp.float32)
    loss3 = jax.block_until_ready(metric(pred3, lbl3))
    ref3 = jnp.mean((pred3 - lbl3) ** 2)
    assert jnp.allclose(loss3, ref3, rtol=1e-5, atol=1e-6), (loss3, ref3)

    # exercise the tracker semantics
    metric.update(loss, B)
    _ = metric.get_loss()
    metric.reset()

    print("KERNEL_OK")
</pallas_src>

<mosaic_0001>
module attributes {stable_mosaic.version = 11 : i64} {
  func.func @kernel(%arg0: i32, %arg1: i32, %arg2: memref<2x8x128xf32, #tpu.memory_space<vmem>>, %arg3: memref<2x8x128xf32, #tpu.memory_space<vmem>>, %arg4: memref<8x128xf32, #tpu.memory_space<vmem>>) attributes {dimension_semantics = [#tpu.dimension_semantics<parallel>, #tpu.dimension_semantics<arbitrary>], iteration_bounds = array<i64: 1, 1>, scalar_prefetch = 0 : i64, scratch_operands = 0 : i64, tpu.core_type = #tpu.core_type<tc>, window_params = [{transform_indices = @transform_0, window_bounds = array<i64: 2, 8, 128>}, {transform_indices = @transform_1, window_bounds = array<i64: 2, 8, 128>}, {transform_indices = @transform_2, window_bounds = array<i64: 8, 128>}]} {
    %c0_i32 = arith.constant 0 : i32
    %0 = arith.cmpi eq, %arg1, %c0_i32 : i32
    %1 = arith.extui %0 : i1 to i32
    %c0_i32_0 = arith.constant 0 : i32
    %2 = arith.cmpi ne, %1, %c0_i32_0 : i32
    scf.if %2 {
      %cst_10 = arith.constant 0.000000e+00 : f32
      %17 = vector.broadcast %cst_10 : f32 to vector<8x128xf32>
      %c0_11 = arith.constant 0 : index
      %c0_12 = arith.constant 0 : index
      %18 = vector.load %arg4[%c0_11, %c0_12] : memref<8x128xf32, #tpu.memory_space<vmem>>, vector<8x128xf32>
      tpu.vector_store %arg4[%c0_11, %c0_12], %17 {strides = array<i32>} : memref<8x128xf32, #tpu.memory_space<vmem>>, vector<8x128xf32>,
    } else {
    }
    %cst = arith.constant 0.000000e+00 : f32
    %3 = vector.broadcast %cst : f32 to vector<8x128xf32>
    %c0_i32_1 = arith.constant 0 : i32
    %c2_i32 = arith.constant 2 : i32
    %4 = arith.muli %c0_i32_1, %c2_i32 : i32
    %5 = tpu.assume_multiple %4, 2 : i32
    %6 = arith.index_cast %5 : i32 to index
    %c0 = arith.constant 0 : index
    %c0_2 = arith.constant 0 : index
    %7 = vector.load %arg2[%6, %c0, %c0_2] : memref<2x8x128xf32, #tpu.memory_space<vmem>>, vector<2x8x128xf32>
    %8 = arith.index_cast %5 : i32 to index
    %c0_3 = arith.constant 0 : index
    %c0_4 = arith.constant 0 : index
    %9 = vector.load %arg3[%8, %c0_3, %c0_4] : memref<2x8x128xf32, #tpu.memory_space<vmem>>, vector<2x8x128xf32>
    %10 = arith.subf %7, %9 : vector<2x8x128xf32>
    %11 = arith.mulf %10, %10 : vector<2x8x128xf32>
    %cst_5 = arith.constant dense<0.000000e+00> : vector<8x128xf32>
    %12 = vector.multi_reduction <add>, %11, %cst_5 [0] : vector<2x8x128xf32> to vector<8x128xf32>
    %13 = arith.addf %3, %12 : vector<8x128xf32>
    %c1_i32 = arith.constant 1 : i32
    %c0_6 = arith.constant 0 : index
    %c0_7 = arith.constant 0 : index
    %14 = vector.load %arg4[%c0_6, %c0_7] : memref<8x128xf32, #tpu.memory_space<vmem>>, vector<8x128xf32>
    %15 = arith.addf %14, %13 : vector<8x128xf32>
    %c0_8 = arith.constant 0 : index
    %c0_9 = arith.constant 0 : index
    %16 = vector.load %arg4[%c0_8, %c0_9] : memref<8x128xf32, #tpu.memory_space<vmem>>, vector<8x128xf32>
    tpu.vector_store %arg4[%c0_8, %c0_9], %15 {strides = array<i32>} : memref<8x128xf32, #tpu.memory_space<vmem>>, vector<8x128xf32>,
    return
  }
  func.func @transform_0(%arg0: i32, %arg1: i32) -> (i32, i32, i32) {
    %c1_i32 = arith.constant 1 : i32
    %0 = arith.muli %arg0, %c1_i32 : i32
    %1 = arith.addi %0, %arg1 : i32
    %c0_i32 = arith.constant 0 : i32
    %2 = arith.minsi %1, %c0_i32 : i32
    %c0_i32_0 = arith.constant 0 : i32
    %c0_i32_1 = arith.constant 0 : i32
    %c0_i32_2 = arith.constant 0 : i32
    return %2, %c0_i32_0, %c0_i32_1 : i32, i32, i32
  }
  func.func @transform_1(%arg0: i32, %arg1: i32) -> (i32, i32, i32) {
    %c1_i32 = arith.constant 1 : i32
    %0 = arith.muli %arg0, %c1_i32 : i32
    %1 = arith.addi %0, %arg1 : i32
    %c0_i32 = arith.constant 0 : i32
    %2 = arith.minsi %1, %c0_i32 : i32
    %c0_i32_0 = arith.constant 0 : i32
    %c0_i32_1 = arith.constant 0 : i32
    %c0_i32_2 = arith.constant 0 : i32
    return %2, %c0_i32_0, %c0_i32_1 : i32, i32, i32
  }
  func.func @transform_2(%arg0: i32, %arg1: i32) -> (i32, i32) {
    %c0_i32 = arith.constant 0 : i32
    %c0_i32_0 = arith.constant 0 : i32
    return %arg0, %c0_i32 : i32, i32
  }
}

</mosaic_0001>

<bundles_post_ra>
// kernel: _mse_loss_impl.1
= control target key start
LH: loop header
LB: loop body
LE: loop exit
PB: predicated region body
PF: predicated region fallthrough
CT: control target
= control target key end

     0   :  { %s143_s0 = inlined_call_operand.vmem [shape: f32[2,8,128], index: 0, kind: input, shape index: {}]   ;;  %s144_s1 = inlined_call_operand.vmem [shape: f32[2,8,128], index: 1, kind: input, shape index: {}]   ;;  %s145_s2 = inlined_call_operand.vmem [shape: f32[8,128], index: 2, kind: output, shape index: {}]  }
   0x1   :  { %v82_v0 = vld [vmem:[%s143_s0] sm:$0xff]  ;;  %v83_v1 = vld [vmem:[%s143_s0 + $0x8] sm:$0xff] }
   0x2   :  { %v85_v2 = vld [vmem:[%s144_s1] sm:$0xff]  ;;  %v86_v3 = vld [vmem:[%s144_s1 + $0x8] sm:$0xff] }
   0x3   :  { %v87_v4 = vsub.f32 %v82_v0, %v85_v2  ;;  %v88_v5 = vsub.f32 %v83_v1, %v86_v3 }
   0x5   :  { %v89_v6 = vmul.f32 %v87_v4, %v87_v4  ;;  %v90_v7 = vmul.f32 %v88_v5, %v88_v5 }
   0x7   :  { %v91_v8 = vadd.f32 %v90_v7, %v89_v6 }
   0x9   :  { %95 = vst [vmem:[%s145_s2] sm:$0xff] %v91_v8 }

</bundles_post_ra>
